<compile_context>
chip_gen: v5e
topology: v5e:2x2
jax: 0.10.0
libtpu: 0.0.40
codegen_flags: <defaults>
</compile_context>

<pallas_src>
import functools

import jax
import jax.numpy as jnp
from jax import lax
from jax.experimental import pallas as pl
from jax.experimental.pallas import tpu as pltpu


def _round_up(x, m):
    return (x + m - 1) // m * m


def _fc_block_kernel(seed_ref, x_ref, w_ref, b_ref, o_ref, acc_ref, *,
                     dropout_p, training, use_hw_prng):
    # Hoisted: program_id must not be first introduced inside a pl.when body
    # (interpret-mode lowering limitation).
    i = pl.program_id(0)
    j = pl.program_id(1)
    k = pl.program_id(2)
    nk = pl.num_programs(2)

    @pl.when(k == 0)
    def _init():
        # Fold the bias into the accumulator init (saves a (tm,tn) VPU add
        # and a temporary in the last-k epilogue).
        acc_ref[...] = jnp.broadcast_to(
            b_ref[...].astype(jnp.float32), acc_ref.shape)

    # Cast the activation tile in-kernel (no wrapper-side HBM round trip) and
    # run the MXU fast path with bf16 operands; accumulate in f32.
    acc_ref[...] += jnp.dot(x_ref[...].astype(w_ref.dtype), w_ref[...],
                            preferred_element_type=jnp.float32)

    @pl.when(k == nk - 1)
    def _finalize():
        y = acc_ref[...]
        tm, tn = acc_ref.shape

        if training and dropout_p >= 1.0:
            y = jnp.zeros_like(y)
        elif training and dropout_p > 0.0:
            thresh = jnp.uint32(
                min(int(round(dropout_p * 2.0 ** 32)), 2 ** 32 - 1))
            if use_hw_prng:
                # Real TPU: hardware PRNG (cheap, no extra VALU work).
                pltpu.prng_seed(seed_ref[0], i, j)
                bits = pltpu.prng_random_bits((tm, tn))
                if bits.dtype != jnp.uint32:
                    bits = pltpu.bitcast(bits, jnp.uint32)
            else:
                # Fallback (interpret mode / non-TPU backend): counter-based
                # hash on global (row, col).  Rank-1 row/col terms combined
                # with one broadcast add keep live vregs low.
                rows = lax.broadcasted_iota(jnp.int32, (tm, 1), 0) + i * tm
                cols = lax.broadcasted_iota(jnp.int32, (1, tn), 1) + j * tn
                h = (rows.astype(jnp.uint32) * jnp.uint32(0x9E3779B1)
                     + cols.astype(jnp.uint32) * jnp.uint32(0x85EBCA6B)
                     + seed_ref[0].astype(jnp.uint32))
                h = h ^ (h >> 16)
                h = h * jnp.uint32(0x7FEB352D)
                h = h ^ (h >> 15)
                h = h * jnp.uint32(0x846CA68B)
                h = h ^ (h >> 16)
                bits = h
            keep = bits >= thresh  # P(drop) = thresh / 2^32 ~= dropout_p
            y = jnp.where(keep,
                          y * jnp.float32(1.0 / (1.0 - dropout_p)),
                          jnp.float32(0.0))

        o_ref[...] = jnp.maximum(y, 0.0).astype(o_ref.dtype)


def prepare_fc_params(weight, bias, *, tn=512, tk=512, dtype=jnp.bfloat16):
    """One-time (init) parameter prep.

    weight: [N, K] (PyTorch nn.Linear layout), bias: [N].
    Transposes to [K, N], pads K/N only when they exceed one lane-dense tile
    (tiny dims use the full unpadded dim as the block extent), and casts the
    weight (bf16 by default for the MXU fast path; pass jnp.float32 for an
    exact path).
    """
    # TODO(synk): per-generation int8 (v5e) / fp8 (v7x) weight paths for
    # weight-streaming-bound inference are not implemented; bf16 is the
    # portable default.
    N, K = weight.shape

    if N <= 128:                      # full-dim block, no padding waste
        tn_eff, n_pad = N, N
    else:
        tn_eff = min(_round_up(tn, 128), _round_up(N, 128))
        n_pad = _round_up(N, tn_eff)

    if K <= 128:
        tk_eff, k_pad = K, K
    else:
        tk_eff = min(_round_up(tk, 128), _round_up(K, 128))
        k_pad = _round_up(K, tk_eff)

    w_kn = weight.T                   # one-time transpose, not per call
    if dtype is not None:
        w_kn = w_kn.astype(dtype)
    if (k_pad, n_pad) != (K, N):
        w_kn = jnp.pad(w_kn, ((0, k_pad - K), (0, n_pad - N)))
    b2 = jnp.pad(bias.astype(jnp.float32), (0, n_pad - N)).reshape(1, n_pad)

    return {"w": w_kn, "b": b2, "N": N, "K": K,
            "tn": tn_eff, "tk": tk_eff, "N_pad": n_pad, "K_pad": k_pad}


def fc_block_forward(x, params, *, dropout_p, training, seed=0, tm=256):
    """x: [..., K] -> ReLU(Dropout(x @ W^T + b)), returns [..., N]."""
    assert 0.0 <= dropout_p <= 1.0
    lead = x.shape[:-1]
    K = x.shape[-1]
    assert K == params["K"], "input feature size mismatch"
    x2 = x.reshape(-1, K)
    M = x2.shape[0]

    w, b = params["w"], params["b"]
    k_pad, n_pad = w.shape
    tn, tk, N = params["tn"], params["tk"], params["N"]
    out_dtype = x.dtype

    # Sublane alignment: 16 rows for sub-32-bit activations (bf16 packing).
    row_align = 8 if jnp.dtype(x.dtype).itemsize >= 4 else 16
    if M <= tm:
        tm = _round_up(M, row_align)
        m_pad = tm
    else:
        tm = _round_up(tm, row_align)
        m_pad = _round_up(M, tm)

    grid_m = m_pad // tm
    grid_n = n_pad // tn
    # v7x megacore: make sure at least one parallel axis has >= 2 blocks.
    if grid_m == 1 and grid_n == 1:
        if tn >= 256 and tn % 256 == 0:
            tn //= 2
            grid_n = 2
        elif tm >= 2 * row_align and tm % (2 * row_align) == 0:
            tm //= 2
            grid_m = 2
    grid_k = k_pad // tk

    # Pad only; dtype cast happens in-kernel (no extra HBM pass for the cast).
    if (m_pad, k_pad) != (M, K):
        x_p = jnp.pad(x2, ((0, m_pad - M), (0, k_pad - K)))
    else:
        x_p = x2

    seed_arr = jnp.asarray([seed], dtype=jnp.int32)
    use_hw_prng = jax.default_backend() == "tpu"

    kernel = functools.partial(
        _fc_block_kernel,
        dropout_p=float(dropout_p), training=bool(training),
        use_hw_prng=use_hw_prng,
    )

    x_item = jnp.dtype(x.dtype).itemsize
    w_item = jnp.dtype(w.dtype).itemsize
    o_item = jnp.dtype(out_dtype).itemsize

    # Double-buffered tile budget + accumulator, with headroom; capped so it
    # also fits v7x's 64 MiB per-TC VMEM, raised above v5e's 16 MiB default.
    needed = (2 * tm * tk * x_item + 2 * tk * tn * w_item
              + 2 * tm * tn * o_item + tm * tn * 4 + 2 * tn * 4)
    vmem_limit = int(min(48 * 1024 * 1024,
                         max(needed + 4 * 1024 * 1024, 32 * 1024 * 1024)))

    cost = pl.CostEstimate(
        flops=2 * m_pad * n_pad * k_pad,
        transcendentals=0,
        bytes_accessed=(m_pad * k_pad * x_item * grid_n
                        + k_pad * n_pad * w_item * grid_m
                        + n_pad * 4 * grid_m
                        + m_pad * n_pad * o_item),
    )

    out = pl.pallas_call(
        kernel,
        out_shape=jax.ShapeDtypeStruct((m_pad, n_pad), out_dtype),
        grid_spec=pltpu.PrefetchScalarGridSpec(
            num_scalar_prefetch=1,
            grid=(grid_m, grid_n, grid_k),
            in_specs=[
                pl.BlockSpec((tm, tk), lambda i, j, k, seed: (i, k)),
                pl.BlockSpec((tk, tn), lambda i, j, k, seed: (k, j)),
                pl.BlockSpec((1, tn), lambda i, j, k, seed: (0, j)),
            ],
            out_specs=pl.BlockSpec((tm, tn), lambda i, j, k, seed: (i, j)),
            scratch_shapes=[pltpu.VMEM((tm, tn), jnp.float32)],
        ),
        compiler_params=pltpu.CompilerParams(
            dimension_semantics=("parallel", "parallel", "arbitrary"),
            vmem_limit_bytes=vmem_limit,
        ),
        cost_estimate=cost,
    )(seed_arr, x_p, w, b)

    if (m_pad, n_pad) != (M, N):
        out = out[:M, :N]
    return out.reshape(lead + (N,))


if __name__ == "__main__":
    # Small shapes consistent with FCBlock(input_size, output_size, dropout_p).
    batch, input_size, output_size, dropout_p = 8, 32, 64, 0.1

    key = jax.random.PRNGKey(0)
    kx, kw, kb = jax.random.split(key, 3)

    x = jax.random.normal(kx, (batch, input_size), dtype=jnp.float32)
    bound = 1.0 / (input_size ** 0.5)
    weight = jax.random.uniform(kw, (output_size, input_size),
                                minval=-bound, maxval=bound, dtype=jnp.float32)
    bias = jax.random.uniform(kb, (output_size,),
                              minval=-bound, maxval=bound, dtype=jnp.float32)

    ref = jnp.maximum(x @ weight.T + bias, 0.0)

    # ---- f32 weight path, eval mode (dropout == identity): tight check ----
    params_f32 = prepare_fc_params(weight, bias, dtype=jnp.float32)
    out_eval_f32 = fc_block_forward(x, params_f32, dropout_p=dropout_p,
                                    training=False)
    out_eval_f32 = jax.block_until_ready(out_eval_f32)
    assert out_eval_f32.shape == (batch, output_size)
    assert jnp.allclose(out_eval_f32, ref, atol=1e-5, rtol=1e-5), \
        "f32 eval-mode mismatch"

    # ---- default bf16 weight path (MXU fast mode), eval mode: loose check ----
    params = prepare_fc_params(weight, bias)        # bf16 default
    out_eval = fc_block_forward(x, params, dropout_p=dropout_p, training=False)
    out_eval = jax.block_until_ready(out_eval)
    assert jnp.allclose(out_eval, ref, atol=5e-2, rtol=5e-2), \
        "bf16 eval-mode mismatch"

    # ---- training mode (in-kernel dropout) ----
    # TODO(synk): dropout mask uses TPU HW PRNG (or a counter hash off-TPU),
    # not torch's RNG stream, so masks are not bit-identical to PyTorch (only
    # the distribution / 1/(1-p) scaling semantics match).
    out_train = fc_block_forward(x, params, dropout_p=dropout_p,
                                 training=True, seed=123)
    out_train = jax.block_until_ready(out_train)
    assert out_train.shape == (batch, output_size)
    assert bool(jnp.all(out_train >= 0.0))          # ReLU after dropout
    assert not jnp.allclose(out_train, out_eval)    # dropout actually applied

    print("KERNEL_OK")
</pallas_src>

<mosaic_0001>
module attributes {stable_mosaic.version = 11 : i64} {
  func.func @_fc_block_kernel(%arg0: i32, %arg1: i32, %arg2: i32, %arg3: memref<1xi32, #tpu.memory_space<smem>>, %arg4: memref<8x32xf32, #tpu.memory_space<vmem>>, %arg5: memref<32x64xf32, #tpu.memory_space<vmem>>, %arg6: memref<1x64xf32, #tpu.memory_space<vmem>>, %arg7: memref<8x64xf32, #tpu.memory_space<vmem>>, %arg8: memref<8x64xf32, #tpu.memory_space<vmem>>) attributes {dimension_semantics = [#tpu.dimension_semantics<parallel>, #tpu.dimension_semantics<parallel>, #tpu.dimension_semantics<arbitrary>], iteration_bounds = array<i64: 1, 1, 1>, scalar_prefetch = 1 : i64, scratch_operands = 1 : i64, tpu.core_type = #tpu.core_type<tc>, window_params = [{transform_indices = @transform_0, window_bounds = array<i64: 8, 32>}, {transform_indices = @transform_1, window_bounds = array<i64: 32, 64>}, {transform_indices = @transform_2, window_bounds = array<i64: 1, 64>}, {transform_indices = @transform_3, window_bounds = array<i64: 8, 64>}]} {
    %c0_i32 = arith.constant 0 : i32
    %0 = arith.cmpi eq, %arg2, %c0_i32 : i32
    %1 = arith.extui %0 : i1 to i32
    %c0_i32_0 = arith.constant 0 : i32
    %2 = arith.cmpi ne, %1, %c0_i32_0 : i32
    scf.if %2 {
      %c0_10 = arith.constant 0 : index
      %c0_11 = arith.constant 0 : index
      %12 = vector.load %arg6[%c0_10, %c0_11] : memref<1x64xf32, #tpu.memory_space<vmem>>, vector<1x64xf32>
      %13 = vector.shape_cast %12 : vector<1x64xf32> to vector<1x64xf32>
      %14 = vector.broadcast %13 : vector<1x64xf32> to vector<8x64xf32>
      %c0_12 = arith.constant 0 : index
      %c0_13 = arith.constant 0 : index
      %15 = vector.load %arg8[%c0_12, %c0_13] : memref<8x64xf32, #tpu.memory_space<vmem>>, vector<8x64xf32>
      tpu.vector_store %arg8[%c0_12, %c0_13], %14 {strides = array<i32>} : memref<8x64xf32, #tpu.memory_space<vmem>>, vector<8x64xf32>,
    } else {
    }
    %c0 = arith.constant 0 : index
    %c0_1 = arith.constant 0 : index
    %3 = vector.load %arg8[%c0, %c0_1] : memref<8x64xf32, #tpu.memory_space<vmem>>, vector<8x64xf32>
    %c0_2 = arith.constant 0 : index
    %c0_3 = arith.constant 0 : index
    %4 = vector.load %arg4[%c0_2, %c0_3] : memref<8x32xf32, #tpu.memory_space<vmem>>, vector<8x32xf32>
    %c0_4 = arith.constant 0 : index
    %c0_5 = arith.constant 0 : index
    %5 = vector.load %arg5[%c0_4, %c0_5] : memref<32x64xf32, #tpu.memory_space<vmem>>, vector<32x64xf32>
    %cst = arith.constant dense<0.000000e+00> : vector<8x64xf32>
    %6 = tpu.matmul %4, %5, %cst {dimension_numbers = #tpu.dot_dimension_numbers<[1], [0], [0], [1], [0, 0, 1, 1], [], []>} : vector<8x32xf32>, vector<32x64xf32>, vector<8x64xf32> -> vector<8x64xf32>
    %7 = arith.addf %3, %6 : vector<8x64xf32>
    %c0_6 = arith.constant 0 : index
    %c0_7 = arith.constant 0 : index
    %8 = vector.load %arg8[%c0_6, %c0_7] : memref<8x64xf32, #tpu.memory_space<vmem>>, vector<8x64xf32>
    tpu.vector_store %arg8[%c0_6, %c0_7], %7 {strides = array<i32>} : memref<8x64xf32, #tpu.memory_space<vmem>>, vector<8x64xf32>,
    %c0_i32_8 = arith.constant 0 : i32
    %9 = arith.cmpi eq, %arg2, %c0_i32_8 : i32
    %10 = arith.extui %9 : i1 to i32
    %c0_i32_9 = arith.constant 0 : i32
    %11 = arith.cmpi ne, %10, %c0_i32_9 : i32
    scf.if %11 {
      %c0_10 = arith.constant 0 : index
      %c0_11 = arith.constant 0 : index
      %12 = vector.load %arg8[%c0_10, %c0_11] : memref<8x64xf32, #tpu.memory_space<vmem>>, vector<8x64xf32>
      %cst_12 = arith.constant 0.000000e+00 : f32
      %13 = vector.broadcast %cst_12 : f32 to vector<8x64xf32>
      %14 = arith.maximumf %12, %13 : vector<8x64xf32>
      %c0_13 = arith.constant 0 : index
      %c0_14 = arith.constant 0 : index
      %15 = vector.load %arg7[%c0_13, %c0_14] : memref<8x64xf32, #tpu.memory_space<vmem>>, vector<8x64xf32>
      tpu.vector_store %arg7[%c0_13, %c0_14], %14 {strides = array<i32>} : memref<8x64xf32, #tpu.memory_space<vmem>>, vector<8x64xf32>,
    } else {
    }
    return
  }
  func.func @transform_0(%arg0: i32, %arg1: i32, %arg2: i32, %arg3: memref<1xi32, #tpu.memory_space<smem>>) -> (i32, i32) {
    %c0_i32 = arith.constant 0 : i32
    return %arg0, %arg2 : i32, i32
  }
  func.func @transform_1(%arg0: i32, %arg1: i32, %arg2: i32, %arg3: memref<1xi32, #tpu.memory_space<smem>>) -> (i32, i32) {
    %c0_i32 = arith.constant 0 : i32
    return %arg2, %arg1 : i32, i32
  }
  func.func @transform_2(%arg0: i32, %arg1: i32, %arg2: i32, %arg3: memref<1xi32, #tpu.memory_space<smem>>) -> (i32, i32) {
    %c0_i32 = arith.constant 0 : i32
    %c0_i32_0 = arith.constant 0 : i32
    return %c0_i32, %arg1 : i32, i32
  }
  func.func @transform_3(%arg0: i32, %arg1: i32, %arg2: i32, %arg3: memref<1xi32, #tpu.memory_space<smem>>) -> (i32, i32) {
    %c0_i32 = arith.constant 0 : i32
    return %arg0, %arg1 : i32, i32
  }
}

</mosaic_0001>

<bundles_post_ra>
// kernel: tpu_custom_call.1
= control target key start
LH: loop header
LB: loop body
LE: loop exit
PB: predicated region body
PF: predicated region fallthrough
CT: control target
= control target key end

     0   :  { %10 = vsyncpa [#allocation6], 0  ;;  %s244_s0 = inlined_call_operand.<no memory space> [shape: s32[1], index: 0, kind: input, shape index: {}]   ;;  %s245_s1 = inlined_call_operand.hbm [shape: f32[8,32], index: 1, kind: input, shape index: {}]   ;;  %s246_s2 = inlined_call_operand.hbm [shape: f32[32,64], index: 2, kind: input, shape index: {}]   ;;  %s247_s3 = inlined_call_operand.vmem [shape: f32[1,64], index: 3, kind: input, shape index: {}]   ;;  %s248_s4 = inlined_call_operand.hbm [shape: f32[8,64], index: 4, kind: output, shape index: {}]  }
   0x1   :  { %11 = vsyncpa [#allocation9], 0 }
   0x2   :  { %12 = vsyncpa [#allocation7], 0  ;;  %s18_s17 = sshll.u32 %s245_s1, 4  ;;  %s199_s0 = smov [#allocation5]   ;;  %s19_s17 = int_to_ptr.hbm [resolvable:$true] %s18_s17 }
   0x3   :  { %s20_s18 = sshll.u32 %s199_s0, 4  ;;  %s28_s21 = sshll.u32 %s246_s2, 4  ;;  %s21_s18 = int_to_ptr.vmem [resolvable:$true] %s20_s18  ;;  %s29_s21 = int_to_ptr.hbm [resolvable:$true] %s28_s21 }
   0x4   :  { %23 = dma.hbm_to_vmem [thread:$0]  %s19_s17, 128, %s21_s18, [#allocation6]  }
   0x5   :  { %s200_s22 = smov [#allocation8]   ;;  %s201_s24 = smov 128  }
   0x6   :  { %s30_s23 = sshll.u32 %s200_s22, 4  ;;  %s202_s25 = smov 8   ;;  %s31_s23 = int_to_ptr.vmem [resolvable:$true] %s30_s23 }
   0x7   :  { %36 = dma.hbm_to_vmem [thread:$0]  %s29_s21, 512, %s31_s23, [#allocation9], %s201_s24, %s201_s24, %s202_s25  }
   0x8   :  { %193 = dma.done.wait [#allocation6], 128  }
   0x9   :  { %194 = vsyncadd [#allocation6], 4294967168 }
   0xa   :  { %195 = dma.done.wait [#allocation9], 512  }
   0xb   :  { %196 = vsyncadd [#allocation9], 4294966784  ;;  %v62_v0 = vld [vmem:[#allocation8 + $0x18] sm:$0xff]  ;;  %v61_v1 = vld [vmem:[#allocation8 + $0x10] sm:$0xff]  ;;  %vm55_vm0 = vcmask 523264   ;;  %vm63_vm1 = vcmask 261120  }
   0xc   :  { %79 = vmatpush.msra.mxu0 %v62_v0  ;;  %v60_v2 = vld [vmem:[#allocation8 + $0x8] sm:$0xff]  ;;  %v120_v3 = vld [vmem:[%s247_s3] ss:$0 sm:$0xff]  ;;  %v59_v4 = vld [vmem:[#allocation8] sm:$0xff]  ;;  %s203_s2 = smov [#allocation10]   ;;  %s103_s3 = sshll.u32 %s248_s4, 4  ;;  %s104_s3 = int_to_ptr.hbm [resolvable:$true] %s103_s3 }
   0xd   :  { %56 = vst.msk [vmem:[#allocation2] sm:$0xff] %vm55_vm0, %v120_v3  ;;  %v58_v5 = vld [vmem:[#allocation5] sm:$0xff]  ;;  %s101_s27 = sshll.u32 %s203_s2, 4  ;;  %s102_s27 = int_to_ptr.vmem [resolvable:$true] %s101_s27 }
   0xe   :  { %80 = vmatpush.msra.mxu0 %v61_v1 }
  0x10   :  { %81 = vmatpush.msra.mxu0 %v60_v2 }
  0x12   :  { %82 = vmatpush.msra.mxu0 %v59_v4 }
  0x13   :  { %114 = vmatmul.msk.f32.vlgmr.msra.gmra.mxu0 %vm63_vm1, %v58_v5 }
  0x14   :  { %v57_v6 = vld [vmem:[#allocation2] sm:$0xff] }
  0x90   :  { %v84_v7 = vpop.f32.mrf.mxu0 }
  0x91   :  { %v87_v8 = vadd.f32 %v84_v7, %v57_v6 }
  0x93   :  { %89 = vst.msk [vmem:[#allocation2] sm:$0xff] %vm55_vm0, %v87_v8 }
  0x9a   :  { %v93_v9 = vld [vmem:[#allocation2] sm:$0xff] }
  0x9b   :  { %v94_v10 = vmax.f32 %v93_v9, 0.0 }
  0x9d   :  { %95 = vst.msk [vmem:[#allocation10] sm:$0xff] %vm55_vm0, %v94_v10 }
  0x9e   :  { %106 = dma.vmem_to_hbm [thread:$0]  %s102_s27, 128, %s104_s3, [#allocation7]  }
  0x9f   :  { %197 = dma.done.wait [#allocation7], 128  }
  0xa0   :  { %198 = vsyncadd [#allocation7], 4294967168 }
  0xa1   :  { %111 = vsyncpa [#allocation6], 1 }
  0xa2   :  { %112 = vsyncpa [#allocation9], 1 }
  0xa3   :  { %113 = vsyncpa [#allocation7], 1 }

</bundles_post_ra>
